<compile_context>
chip_gen: v7x
topology: tpu7x:2x2x1
jax: 0.10.0
libtpu: 0.0.40
codegen_flags: <defaults>
</compile_context>

<pallas_src>
import jax
import jax.numpy as jnp
from jax.experimental import pallas as pl
from jax.experimental.pallas import tpu as pltpu

ATT_PAD = 128  # lane-padded width of the 3-way attention logits


def _round_up(x, m):
    return (x + m - 1) // m * m


def _ceil_div(a, b):
    return (a + b - 1) // b


# --------------------------------------------------------------------------
# Kernel
# --------------------------------------------------------------------------
def combiner_kernel(e1_ref, e2_ref, e3_ref, w1_ref, b1_ref, w2_ref, b2_ref,
                    out_ref):
    bf = jnp.bfloat16

    # att1: Linear(3D -> D) as three accumulating MXU dots (bf16 operands,
    # f32 accumulation).  w1_ref is the pre-packed (3, D, D) [group, in, out]
    # block; no [T, 3D] concat temporary is ever materialized.
    h = (jnp.dot(e1_ref[...].astype(bf), w1_ref[0],
                 preferred_element_type=jnp.float32)
         + jnp.dot(e2_ref[...].astype(bf), w1_ref[1],
                   preferred_element_type=jnp.float32)
         + jnp.dot(e3_ref[...].astype(bf), w1_ref[2],
                   preferred_element_type=jnp.float32)
         + b1_ref[...])
    h = jnp.maximum(h, 0.0)                                  # F.relu(inplace)

    # TODO(synk): F.dropout with training=True would need pltpu.prng_* masking;
    # eval-mode forward (training=False) is the identity, which is what we do.

    # att2: Linear(D -> 3), lane-padded to 128 outputs; padded logits carry a
    # -1e30 bias (kept in f32) so exp() of the pads is exactly 0 in softmax.
    logits = jnp.dot(h.astype(bf), w2_ref[...],
                     preferred_element_type=jnp.float32) + b2_ref[...]

    m = jnp.max(logits, axis=-1, keepdims=True)
    ex = jnp.exp(logits - m)
    att = ex * pl.reciprocal(jnp.sum(ex, axis=-1, keepdims=True), approx=True)

    # Final weighted sum in f32; re-read the embeddings from the VMEM refs
    # (cheap vlds) instead of keeping three f32 tiles live across the matmuls.
    out = (e1_ref[...] * att[:, 0:1]
           + e2_ref[...] * att[:, 1:2]
           + e3_ref[...] * att[:, 2:3])
    out_ref[...] = out.astype(out_ref.dtype)


# --------------------------------------------------------------------------
# Wrapper helpers
# --------------------------------------------------------------------------
def _vmem_capacity_bytes():
    """Generation-aware VMEM capacity (v5e/v6e: 128 MiB, v7x: 64 MiB/TC)."""
    try:
        info = pltpu.get_tpu_info()
        cap = getattr(info, "vmem_capacity_bytes", None)
        if cap:
            return int(cap)
    except Exception:
        pass
    return 64 * 1024 * 1024  # conservative default (safe on all generations)


def _choose_row_tile(n_rows, d, budget, *, max_tile=2048):
    """Largest multiple-of-8 row tile whose double-buffered row traffic plus
    single-buffered weight blocks fits the (generation-aware) VMEM budget.
    Also capped so the row grid has >= 2 steps whenever N allows it, so the
    'parallel' grid axis can be sharded across both v7x TensorCores."""
    weight_bytes = (3 * d * d + d * ATT_PAD) * 2 + (d + ATT_PAD) * 4
    per_row = (3 + 1) * 2 * d * 4          # 3 inputs + 1 output, x2 buffers, f32
    per_row += d * 16                      # h (f32) + bf16 casts / out temp
    per_row += ATT_PAD * 8                 # logits + exp (f32)
    avail = max(budget - weight_bytes, per_row * 8)
    tile = max(8, min(max_tile, (avail // per_row) // 8 * 8))
    if n_rows > 8:
        # keep at least 2 grid steps (megacore) without shrinking tiles much
        tile = min(tile, max(8, _round_up(_ceil_div(n_rows, 2), 8)))
    return min(tile, _round_up(n_rows, 8))


def pack_combiner_weights(w1, b1, w2, b2):
    """Pack PyTorch-layout weights once (hoist out of the per-call path).
    w1: [D, 3D] (att1.weight, [out, in]),  b1: [D]
    w2: [3, D]  (att2.weight, [out, in]),  b2: [3]"""
    D = w1.shape[0]
    # [out, g*D+in] -> [g, in, out]
    w1g = jnp.transpose(w1.reshape(D, 3, D), (1, 2, 0)).astype(jnp.bfloat16)
    b1r = b1.reshape(1, D).astype(jnp.float32)
    w2p = (jnp.zeros((D, ATT_PAD), jnp.float32)
           .at[:, :3].set(jnp.transpose(w2))).astype(jnp.bfloat16)
    b2p = jnp.full((1, ATT_PAD), -1e30, jnp.float32).at[0, :3].set(b2)
    return w1g, b1r, w2p, b2p


def _const_specs(D, single_buffer):
    kw = dict(pipeline_mode=pl.Buffered(1)) if single_buffer else {}
    return [
        pl.BlockSpec((3, D, D), lambda i: (0, 0, 0), **kw),       # w1 (bf16)
        pl.BlockSpec((1, D), lambda i: (0, 0), **kw),             # b1 (f32)
        pl.BlockSpec((D, ATT_PAD), lambda i: (0, 0), **kw),       # w2 (bf16)
        pl.BlockSpec((1, ATT_PAD), lambda i: (0, 0), **kw),       # b2 (f32)
    ]


def combiner_forward_packed(e1, e2, e3, w1g, b1r, w2p, b2p, *, row_tile=None):
    """e1,e2,e3: [N, D]; packed weights from pack_combiner_weights()."""
    N, D = e1.shape
    capacity = _vmem_capacity_bytes()
    budget = max(24 * 1024 * 1024, int(capacity * 0.7))
    if row_tile is None:
        row_tile = _choose_row_tile(N, D, budget)
    n_steps = _ceil_div(N, row_tile)

    weight_bytes = (3 * D * D + D * ATT_PAD) * 2 + (D + ATT_PAD) * 4
    vmem_limit = min(int(capacity * 0.9), budget + weight_bytes)

    row_spec = pl.BlockSpec((row_tile, D), lambda i: (i, 0))

    # Advisory cost estimate for XLA scheduling of the surrounding gathers.
    flops = 2 * N * (3 * D) * D + 2 * N * D * ATT_PAD + 12 * N * D
    bytes_accessed = 4 * N * D * e1.dtype.itemsize + weight_bytes

    def build(single_buffer_weights):
        return pl.pallas_call(
            combiner_kernel,
            out_shape=jax.ShapeDtypeStruct((N, D), e1.dtype),
            grid_spec=pltpu.PrefetchScalarGridSpec(
                num_scalar_prefetch=0,
                grid=(n_steps,),
                in_specs=[row_spec, row_spec, row_spec]
                         + _const_specs(D, single_buffer_weights),
                out_specs=row_spec,
            ),
            compiler_params=pltpu.CompilerParams(
                dimension_semantics=("parallel",),
                vmem_limit_bytes=int(vmem_limit)),
            cost_estimate=pl.CostEstimate(
                flops=int(flops),
                transcendentals=int(N * ATT_PAD),
                bytes_accessed=int(bytes_accessed)),
        )

    try:
        out = build(True)(e1, e2, e3, w1g, b1r, w2p, b2p)
        return jax.block_until_ready(out)
    except Exception:
        # Fallback: default (double) buffering on the grid-invariant operands.
        return build(False)(e1, e2, e3, w1g, b1r, w2p, b2p)


def combiner_forward(e1, e2, e3, w1, b1, w2, b2, *, row_tile=None):
    """Convenience wrapper taking raw PyTorch-layout weights (packs per call;
    prefer pack_combiner_weights + combiner_forward_packed for repeated use)."""
    w1g, b1r, w2p, b2p = pack_combiner_weights(w1, b1, w2, b2)
    return combiner_forward_packed(e1, e2, e3, w1g, b1r, w2p, b2p,
                                   row_tile=row_tile)


# --------------------------------------------------------------------------
# References
# --------------------------------------------------------------------------
def reference_forward(e1, e2, e3, w1, b1, w2, b2):
    """Pure-f32 reference (matches the PyTorch module exactly)."""
    x = jnp.concatenate([e1, e2, e3], axis=1)
    x = jnp.maximum(x @ w1.T + b1, 0.0)
    z = x @ w2.T + b2
    a = jax.nn.softmax(z, axis=1)
    return e1 * a[:, 0:1] + e2 * a[:, 1:2] + e3 * a[:, 2:3]


def reference_forward_mixed(e1, e2, e3, w1, b1, w2, b2):
    """Mixed-precision reference mirroring the kernel (bf16 operands, f32 acc)."""
    x = jnp.concatenate([e1, e2, e3], axis=1)
    h = jnp.dot(x.astype(jnp.bfloat16), jnp.transpose(w1).astype(jnp.bfloat16),
                preferred_element_type=jnp.float32) + b1
    h = jnp.maximum(h, 0.0)
    z = jnp.dot(h.astype(jnp.bfloat16), jnp.transpose(w2).astype(jnp.bfloat16),
                preferred_element_type=jnp.float32) + b2
    a = jax.nn.softmax(z, axis=1)
    return e1 * a[:, 0:1] + e2 * a[:, 1:2] + e3 * a[:, 2:3]


if __name__ == "__main__":
    key = jax.random.PRNGKey(0)
    N, D = 8, 32          # batch of node pairs, embedding_dim
    n_users, n_items = 10, 12

    ks = jax.random.split(key, 12)
    # Simulated embedding{1,2,3}(nodes_u, nodes_i): table lookups (plain-JAX glue).
    nodes_u = jax.random.randint(ks[0], (N,), 0, n_users)
    nodes_i = jax.random.randint(ks[1], (N,), 0, n_items)
    u_tbls = [jax.random.normal(ks[2 + k], (n_users, D), jnp.float32) for k in range(3)]
    i_tbls = [jax.random.normal(ks[5 + k], (n_items, D), jnp.float32) for k in range(3)]
    e1 = u_tbls[0][nodes_u] + i_tbls[0][nodes_i]
    e2 = u_tbls[1][nodes_u] + i_tbls[1][nodes_i]
    e3 = u_tbls[2][nodes_u] + i_tbls[2][nodes_i]

    # Deterministic parameter init (shapes from nn.Linear in __init__).
    lim1 = 1.0 / jnp.sqrt(3.0 * D)
    w1 = jax.random.uniform(ks[8], (D, 3 * D), jnp.float32, -lim1, lim1)   # att1.weight [out,in]
    b1 = jax.random.uniform(ks[9], (D,), jnp.float32, -lim1, lim1)
    lim2 = 1.0 / jnp.sqrt(float(D))
    w2 = jax.random.uniform(ks[10], (3, D), jnp.float32, -lim2, lim2)      # att2.weight [out,in]
    b2 = jax.random.uniform(ks[11], (3,), jnp.float32, -lim2, lim2)

    # Pack weights ONCE (hoisted out of the per-call path), then run the kernel.
    packed = pack_combiner_weights(w1, b1, w2, b2)
    out = combiner_forward_packed(e1, e2, e3, *packed)
    out = jax.block_until_ready(out)
    assert out.shape == (N, D)

    # Tight check vs a mixed-precision (bf16-operand) reference, loose check vs
    # the full-f32 reference (bf16 MXU operands + approx reciprocal perturb the
    # softmax at the ~1e-3 level).
    ref_mixed = reference_forward_mixed(e1, e2, e3, w1, b1, w2, b2)
    ref_f32 = reference_forward(e1, e2, e3, w1, b1, w2, b2)
    assert jnp.allclose(out, ref_mixed, atol=2e-2, rtol=2e-2), "mismatch vs mixed ref"
    assert jnp.allclose(out, ref_f32, atol=6e-2, rtol=6e-2), "mismatch vs f32 ref"
    print("KERNEL_OK")
</pallas_src>

<mosaic_0001>
module attributes {stable_mosaic.version = 11 : i64} {
  func.func @combiner_kernel(%arg0: i32, %arg1: memref<8x32xf32, #tpu.memory_space<vmem>>, %arg2: memref<8x32xf32, #tpu.memory_space<vmem>>, %arg3: memref<8x32xf32, #tpu.memory_space<vmem>>, %arg4: memref<3x32x32xbf16, #tpu.memory_space<vmem>>, %arg5: memref<1x32xf32, #tpu.memory_space<vmem>>, %arg6: memref<32x128xbf16, #tpu.memory_space<vmem>>, %arg7: memref<1x128xf32, #tpu.memory_space<vmem>>, %arg8: memref<8x32xf32, #tpu.memory_space<vmem>>) attributes {dimension_semantics = [#tpu.dimension_semantics<parallel>], iteration_bounds = array<i64: 1>, scalar_prefetch = 0 : i64, scratch_operands = 0 : i64, tpu.core_type = #tpu.core_type<tc>, window_params = [{transform_indices = @transform_0, window_bounds = array<i64: 8, 32>}, {transform_indices = @transform_1, window_bounds = array<i64: 8, 32>}, {transform_indices = @transform_2, window_bounds = array<i64: 8, 32>}, {pipeline_mode = #tpu.pipeline_mode<synchronous>, transform_indices = @transform_3, window_bounds = array<i64: 3, 32, 32>}, {pipeline_mode = #tpu.pipeline_mode<synchronous>, transform_indices = @transform_4, window_bounds = array<i64: 1, 32>}, {pipeline_mode = #tpu.pipeline_mode<synchronous>, transform_indices = @transform_5, window_bounds = array<i64: 32, 128>}, {pipeline_mode = #tpu.pipeline_mode<synchronous>, transform_indices = @transform_6, window_bounds = array<i64: 1, 128>}, {transform_indices = @transform_7, window_bounds = array<i64: 8, 32>}]} {
    %c0 = arith.constant 0 : index
    %c0_0 = arith.constant 0 : index
    %0 = vector.load %arg1[%c0, %c0_0] : memref<8x32xf32, #tpu.memory_space<vmem>>, vector<8x32xf32>
    %1 = arith.truncf %0 : vector<8x32xf32> to vector<8x32xbf16>
    %c0_1 = arith.constant 0 : index
    %c0_2 = arith.constant 0 : index
    %c0_3 = arith.constant 0 : index
    %2 = vector.load %arg4[%c0_1, %c0_2, %c0_3] : memref<3x32x32xbf16, #tpu.memory_space<vmem>>, vector<1x32x32xbf16>
    %3 = vector.shape_cast %2 : vector<1x32x32xbf16> to vector<32x32xbf16>
    %cst = arith.constant dense<0.000000e+00> : vector<8x32xf32>
    %4 = tpu.matmul %1, %3, %cst {dimension_numbers = #tpu.dot_dimension_numbers<[1], [0], [0], [1], [0, 0, 1, 1], [], []>} : vector<8x32xbf16>, vector<32x32xbf16>, vector<8x32xf32> -> vector<8x32xf32>
    %c0_4 = arith.constant 0 : index
    %c0_5 = arith.constant 0 : index
    %5 = vector.load %arg2[%c0_4, %c0_5] : memref<8x32xf32, #tpu.memory_space<vmem>>, vector<8x32xf32>
    %6 = arith.truncf %5 : vector<8x32xf32> to vector<8x32xbf16>
    %c1 = arith.constant 1 : index
    %c0_6 = arith.constant 0 : index
    %c0_7 = arith.constant 0 : index
    %7 = vector.load %arg4[%c1, %c0_6, %c0_7] : memref<3x32x32xbf16, #tpu.memory_space<vmem>>, vector<1x32x32xbf16>
    %8 = vector.shape_cast %7 : vector<1x32x32xbf16> to vector<32x32xbf16>
    %cst_8 = arith.constant dense<0.000000e+00> : vector<8x32xf32>
    %9 = tpu.matmul %6, %8, %cst_8 {dimension_numbers = #tpu.dot_dimension_numbers<[1], [0], [0], [1], [0, 0, 1, 1], [], []>} : vector<8x32xbf16>, vector<32x32xbf16>, vector<8x32xf32> -> vector<8x32xf32>
    %10 = arith.addf %4, %9 : vector<8x32xf32>
    %c0_9 = arith.constant 0 : index
    %c0_10 = arith.constant 0 : index
    %11 = vector.load %arg3[%c0_9, %c0_10] : memref<8x32xf32, #tpu.memory_space<vmem>>, vector<8x32xf32>
    %12 = arith.truncf %11 : vector<8x32xf32> to vector<8x32xbf16>
    %c2 = arith.constant 2 : index
    %c0_11 = arith.constant 0 : index
    %c0_12 = arith.constant 0 : index
    %13 = vector.load %arg4[%c2, %c0_11, %c0_12] : memref<3x32x32xbf16, #tpu.memory_space<vmem>>, vector<1x32x32xbf16>
    %14 = vector.shape_cast %13 : vector<1x32x32xbf16> to vector<32x32xbf16>
    %cst_13 = arith.constant dense<0.000000e+00> : vector<8x32xf32>
    %15 = tpu.matmul %12, %14, %cst_13 {dimension_numbers = #tpu.dot_dimension_numbers<[1], [0], [0], [1], [0, 0, 1, 1], [], []>} : vector<8x32xbf16>, vector<32x32xbf16>, vector<8x32xf32> -> vector<8x32xf32>
    %16 = arith.addf %10, %15 : vector<8x32xf32>
    %c0_14 = arith.constant 0 : index
    %c0_15 = arith.constant 0 : index
    %17 = vector.load %arg5[%c0_14, %c0_15] : memref<1x32xf32, #tpu.memory_space<vmem>>, vector<1x32xf32>
    %18 = vector.broadcast %17 : vector<1x32xf32> to vector<8x32xf32>
    %19 = arith.addf %16, %18 : vector<8x32xf32>
    %cst_16 = arith.constant 0.000000e+00 : f32
    %20 = vector.broadcast %cst_16 : f32 to vector<8x32xf32>
    %21 = arith.maximumf %19, %20 : vector<8x32xf32>
    %22 = arith.truncf %21 : vector<8x32xf32> to vector<8x32xbf16>
    %c0_17 = arith.constant 0 : index
    %c0_18 = arith.constant 0 : index
    %23 = vector.load %arg6[%c0_17, %c0_18] : memref<32x128xbf16, #tpu.memory_space<vmem>>, vector<32x128xbf16>
    %cst_19 = arith.constant dense<0.000000e+00> : vector<8x128xf32>
    %24 = tpu.matmul %22, %23, %cst_19 {dimension_numbers = #tpu.dot_dimension_numbers<[1], [0], [0], [1], [0, 0, 1, 1], [], []>} : vector<8x32xbf16>, vector<32x128xbf16>, vector<8x128xf32> -> vector<8x128xf32>
    %c0_20 = arith.constant 0 : index
    %c0_21 = arith.constant 0 : index
    %25 = vector.load %arg7[%c0_20, %c0_21] : memref<1x128xf32, #tpu.memory_space<vmem>>, vector<1x128xf32>
    %26 = vector.broadcast %25 : vector<1x128xf32> to vector<8x128xf32>
    %27 = arith.addf %24, %26 : vector<8x128xf32>
    %cst_22 = arith.constant dense<0xFF800000> : vector<8xf32>
    %28 = vector.multi_reduction <maximumf>, %27, %cst_22 [1] : vector<8x128xf32> to vector<8xf32>
    %29 = vector.shape_cast %28 : vector<8xf32> to vector<8x1xf32>
    %30 = vector.broadcast %29 : vector<8x1xf32> to vector<8x128xf32>
    %31 = arith.subf %27, %30 : vector<8x128xf32>
    %32 = math.exp %31 : vector<8x128xf32>
    %cst_23 = arith.constant dense<0.000000e+00> : vector<8xf32>
    %33 = vector.multi_reduction <add>, %32, %cst_23 [1] : vector<8x128xf32> to vector<8xf32>
    %34 = vector.shape_cast %33 : vector<8xf32> to vector<8x1xf32>
    %35 = tpu.reciprocal %34 {approx = true} : vector<8x1xf32> -> vector<8x1xf32>
    %36 = vector.broadcast %35 : vector<8x1xf32> to vector<8x128xf32>
    %37 = arith.mulf %32, %36 : vector<8x128xf32>
    %c0_24 = arith.constant 0 : index
    %c0_25 = arith.constant 0 : index
    %38 = vector.load %arg1[%c0_24, %c0_25] : memref<8x32xf32, #tpu.memory_space<vmem>>, vector<8x32xf32>
    %39 = vector.extract_strided_slice %37 {offsets = [0, 0], sizes = [8, 1], strides = [1, 1]} : vector<8x128xf32> to vector<8x1xf32>
    %40 = vector.broadcast %39 : vector<8x1xf32> to vector<8x32xf32>
    %41 = arith.mulf %38, %40 : vector<8x32xf32>
    %c0_26 = arith.constant 0 : index
    %c0_27 = arith.constant 0 : index
    %42 = vector.load %arg2[%c0_26, %c0_27] : memref<8x32xf32, #tpu.memory_space<vmem>>, vector<8x32xf32>
    %43 = vector.extract_strided_slice %37 {offsets = [0, 1], sizes = [8, 1], strides = [1, 1]} : vector<8x128xf32> to vector<8x1xf32>
    %44 = vector.broadcast %43 : vector<8x1xf32> to vector<8x32xf32>
    %45 = arith.mulf %42, %44 : vector<8x32xf32>
    %46 = arith.addf %41, %45 : vector<8x32xf32>
    %c0_28 = arith.constant 0 : index
    %c0_29 = arith.constant 0 : index
    %47 = vector.load %arg3[%c0_28, %c0_29] : memref<8x32xf32, #tpu.memory_space<vmem>>, vector<8x32xf32>
    %48 = vector.extract_strided_slice %37 {offsets = [0, 2], sizes = [8, 1], strides = [1, 1]} : vector<8x128xf32> to vector<8x1xf32>
    %49 = vector.broadcast %48 : vector<8x1xf32> to vector<8x32xf32>
    %50 = arith.mulf %47, %49 : vector<8x32xf32>
    %51 = arith.addf %46, %50 : vector<8x32xf32>
    %c0_30 = arith.constant 0 : index
    %c0_31 = arith.constant 0 : index
    %52 = vector.load %arg8[%c0_30, %c0_31] : memref<8x32xf32, #tpu.memory_space<vmem>>, vector<8x32xf32>
    tpu.vector_store %arg8[%c0_30, %c0_31], %51 {strides = array<i32>} : memref<8x32xf32, #tpu.memory_space<vmem>>, vector<8x32xf32>,
    return
  }
  func.func @transform_0(%arg0: i32) -> (i32, i32) {
    %c0_i32 = arith.constant 0 : i32
    %c0_i32_0 = arith.constant 0 : i32
    return %arg0, %c0_i32 : i32, i32
  }
  func.func @transform_1(%arg0: i32) -> (i32, i32) {
    %c0_i32 = arith.constant 0 : i32
    %c0_i32_0 = arith.constant 0 : i32
    return %arg0, %c0_i32 : i32, i32
  }
  func.func @transform_2(%arg0: i32) -> (i32, i32) {
    %c0_i32 = arith.constant 0 : i32
    %c0_i32_0 = arith.constant 0 : i32
    return %arg0, %c0_i32 : i32, i32
  }
  func.func @transform_3(%arg0: i32) -> (i32, i32, i32) {
    %c0_i32 = arith.constant 0 : i32
    %c0_i32_0 = arith.constant 0 : i32
    %c0_i32_1 = arith.constant 0 : i32
    %c0_i32_2 = arith.constant 0 : i32
    return %c0_i32, %c0_i32_0, %c0_i32_1 : i32, i32, i32
  }
  func.func @transform_4(%arg0: i32) -> (i32, i32) {
    %c0_i32 = arith.constant 0 : i32
    %c0_i32_0 = arith.constant 0 : i32
    %c0_i32_1 = arith.constant 0 : i32
    return %c0_i32, %c0_i32_0 : i32, i32
  }
  func.func @transform_5(%arg0: i32) -> (i32, i32) {
    %c0_i32 = arith.constant 0 : i32
    %c0_i32_0 = arith.constant 0 : i32
    %c0_i32_1 = arith.constant 0 : i32
    return %c0_i32, %c0_i32_0 : i32, i32
  }
  func.func @transform_6(%arg0: i32) -> (i32, i32) {
    %c0_i32 = arith.constant 0 : i32
    %c0_i32_0 = arith.constant 0 : i32
    %c0_i32_1 = arith.constant 0 : i32
    return %c0_i32, %c0_i32_0 : i32, i32
  }
  func.func @transform_7(%arg0: i32) -> (i32, i32) {
    %c0_i32 = arith.constant 0 : i32
    %c0_i32_0 = arith.constant 0 : i32
    return %arg0, %c0_i32 : i32, i32
  }
}

module attributes {stable_mosaic.version = 11 : i64} {
  func.func @combiner_kernel(%arg0: i32, %arg1: memref<8x32xf32, #tpu.memory_space<vmem>>, %arg2: memref<8x32xf32, #tpu.memory_space<vmem>>, %arg3: memref<8x32xf32, #tpu.memory_space<vmem>>, %arg4: memref<3x32x32xbf16, #tpu.memory_space<vmem>>, %arg5: memref<1x32xf32, #tpu.memory_space<vmem>>, %arg6: memref<32x128xbf16, #tpu.memory_space<vmem>>, %arg7: memref<1x128xf32, #tpu.memory_space<vmem>>, %arg8: memref<8x32xf32, #tpu.memory_space<vmem>>) attributes {dimension_semantics = [#tpu.dimension_semantics<parallel>], iteration_bounds = array<i64: 1>, scalar_prefetch = 0 : i64, scratch_operands = 0 : i64, tpu.core_type = #tpu.core_type<tc>, window_params = [{transform_indices = @transform_0, window_bounds = array<i64: 8, 32>}, {transform_indices = @transform_1, window_bounds = array<i64: 8, 32>}, {transform_indices = @transform_2, window_bounds = array<i64: 8, 32>}, {pipeline_mode = #tpu.pipeline_mode<synchronous>, transform_indices = @transform_3, window_bounds = array<i64: 3, 32, 32>}, {pipeline_mode = #tpu.pipeline_mode<synchronous>, transform_indices = @transform_4, window_bounds = array<i64: 1, 32>}, {pipeline_mode = #tpu.pipeline_mode<synchronous>, transform_indices = @transform_5, window_bounds = array<i64: 32, 128>}, {pipeline_mode = #tpu.pipeline_mode<synchronous>, transform_indices = @transform_6, window_bounds = array<i64: 1, 128>}, {transform_indices = @transform_7, window_bounds = array<i64: 8, 32>}]} {
    %c0 = arith.constant 0 : index
    %c0_0 = arith.constant 0 : index
    %0 = vector.load %arg1[%c0, %c0_0] : memref<8x32xf32, #tpu.memory_space<vmem>>, vector<8x32xf32>
    %1 = arith.truncf %0 : vector<8x32xf32> to vector<8x32xbf16>
    %c0_1 = arith.constant 0 : index
    %c0_2 = arith.constant 0 : index
    %c0_3 = arith.constant 0 : index
    %2 = vector.load %arg4[%c0_1, %c0_2, %c0_3] : memref<3x32x32xbf16, #tpu.memory_space<vmem>>, vector<1x32x32xbf16>
    %3 = vector.shape_cast %2 : vector<1x32x32xbf16> to vector<32x32xbf16>
    %cst = arith.constant dense<0.000000e+00> : vector<8x32xf32>
    %4 = tpu.matmul %1, %3, %cst {dimension_numbers = #tpu.dot_dimension_numbers<[1], [0], [0], [1], [0, 0, 1, 1], [], []>} : vector<8x32xbf16>, vector<32x32xbf16>, vector<8x32xf32> -> vector<8x32xf32>
    %c0_4 = arith.constant 0 : index
    %c0_5 = arith.constant 0 : index
    %5 = vector.load %arg2[%c0_4, %c0_5] : memref<8x32xf32, #tpu.memory_space<vmem>>, vector<8x32xf32>
    %6 = arith.truncf %5 : vector<8x32xf32> to vector<8x32xbf16>
    %c1 = arith.constant 1 : index
    %c0_6 = arith.constant 0 : index
    %c0_7 = arith.constant 0 : index
    %7 = vector.load %arg4[%c1, %c0_6, %c0_7] : memref<3x32x32xbf16, #tpu.memory_space<vmem>>, vector<1x32x32xbf16>
    %8 = vector.shape_cast %7 : vector<1x32x32xbf16> to vector<32x32xbf16>
    %cst_8 = arith.constant dense<0.000000e+00> : vector<8x32xf32>
    %9 = tpu.matmul %6, %8, %cst_8 {dimension_numbers = #tpu.dot_dimension_numbers<[1], [0], [0], [1], [0, 0, 1, 1], [], []>} : vector<8x32xbf16>, vector<32x32xbf16>, vector<8x32xf32> -> vector<8x32xf32>
    %10 = arith.addf %4, %9 : vector<8x32xf32>
    %c0_9 = arith.constant 0 : index
    %c0_10 = arith.constant 0 : index
    %11 = vector.load %arg3[%c0_9, %c0_10] : memref<8x32xf32, #tpu.memory_space<vmem>>, vector<8x32xf32>
    %12 = arith.truncf %11 : vector<8x32xf32> to vector<8x32xbf16>
    %c2 = arith.constant 2 : index
    %c0_11 = arith.constant 0 : index
    %c0_12 = arith.constant 0 : index
    %13 = vector.load %arg4[%c2, %c0_11, %c0_12] : memref<3x32x32xbf16, #tpu.memory_space<vmem>>, vector<1x32x32xbf16>
    %14 = vector.shape_cast %13 : vector<1x32x32xbf16> to vector<32x32xbf16>
    %cst_13 = arith.constant dense<0.000000e+00> : vector<8x32xf32>
    %15 = tpu.matmul %12, %14, %cst_13 {dimension_numbers = #tpu.dot_dimension_numbers<[1], [0], [0], [1], [0, 0, 1, 1], [], []>} : vector<8x32xbf16>, vector<32x32xbf16>, vector<8x32xf32> -> vector<8x32xf32>
    %16 = arith.addf %10, %15 : vector<8x32xf32>
    %c0_14 = arith.constant 0 : index
    %c0_15 = arith.constant 0 : index
    %17 = vector.load %arg5[%c0_14, %c0_15] : memref<1x32xf32, #tpu.memory_space<vmem>>, vector<1x32xf32>
    %18 = vector.broadcast %17 : vector<1x32xf32> to vector<8x32xf32>
    %19 = arith.addf %16, %18 : vector<8x32xf32>
    %cst_16 = arith.constant 0.000000e+00 : f32
    %20 = vector.broadcast %cst_16 : f32 to vector<8x32xf32>
    %21 = arith.maximumf %19, %20 : vector<8x32xf32>
    %22 = arith.truncf %21 : vector<8x32xf32> to vector<8x32xbf16>
    %c0_17 = arith.constant 0 : index
    %c0_18 = arith.constant 0 : index
    %23 = vector.load %arg6[%c0_17, %c0_18] : memref<32x128xbf16, #tpu.memory_space<vmem>>, vector<32x128xbf16>
    %cst_19 = arith.constant dense<0.000000e+00> : vector<8x128xf32>
    %24 = tpu.matmul %22, %23, %cst_19 {dimension_numbers = #tpu.dot_dimension_numbers<[1], [0], [0], [1], [0, 0, 1, 1], [], []>} : vector<8x32xbf16>, vector<32x128xbf16>, vector<8x128xf32> -> vector<8x128xf32>
    %c0_20 = arith.constant 0 : index
    %c0_21 = arith.constant 0 : index
    %25 = vector.load %arg7[%c0_20, %c0_21] : memref<1x128xf32, #tpu.memory_space<vmem>>, vector<1x128xf32>
    %26 = vector.broadcast %25 : vector<1x128xf32> to vector<8x128xf32>
    %27 = arith.addf %24, %26 : vector<8x128xf32>
    %cst_22 = arith.constant dense<0xFF800000> : vector<8xf32>
    %28 = vector.multi_reduction <maximumf>, %27, %cst_22 [1] : vector<8x128xf32> to vector<8xf32>
    %29 = vector.shape_cast %28 : vector<8xf32> to vector<8x1xf32>
    %30 = vector.broadcast %29 : vector<8x1xf32> to vector<8x128xf32>
    %31 = arith.subf %27, %30 : vector<8x128xf32>
    %32 = math.exp %31 : vector<8x128xf32>
    %cst_23 = arith.constant dense<0.000000e+00> : vector<8xf32>
    %33 = vector.multi_reduction <add>, %32, %cst_23 [1] : vector<8x128xf32> to vector<8xf32>
    %34 = vector.shape_cast %33 : vector<8xf32> to vector<8x1xf32>
    %35 = tpu.reciprocal %34 {approx = true} : vector<8x1xf32> -> vector<8x1xf32>
    %36 = vector.broadcast %35 : vector<8x1xf32> to vector<8x128xf32>
    %37 = arith.mulf %32, %36 : vector<8x128xf32>
    %c0_24 = arith.constant 0 : index
    %c0_25 = arith.constant 0 : index
    %38 = vector.load %arg1[%c0_24, %c0_25] : memref<8x32xf32, #tpu.memory_space<vmem>>, vector<8x32xf32>
    %39 = vector.extract_strided_slice %37 {offsets = [0, 0], sizes = [8, 1], strides = [1, 1]} : vector<8x128xf32> to vector<8x1xf32>
    %40 = vector.broadcast %39 : vector<8x1xf32> to vector<8x32xf32>
    %41 = arith.mulf %38, %40 : vector<8x32xf32>
    %c0_26 = arith.constant 0 : index
    %c0_27 = arith.constant 0 : index
    %42 = vector.load %arg2[%c0_26, %c0_27] : memref<8x32xf32, #tpu.memory_space<vmem>>, vector<8x32xf32>
    %43 = vector.extract_strided_slice %37 {offsets = [0, 1], sizes = [8, 1], strides = [1, 1]} : vector<8x128xf32> to vector<8x1xf32>
    %44 = vector.broadcast %43 : vector<8x1xf32> to vector<8x32xf32>
    %45 = arith.mulf %42, %44 : vector<8x32xf32>
    %46 = arith.addf %41, %45 : vector<8x32xf32>
    %c0_28 = arith.constant 0 : index
    %c0_29 = arith.constant 0 : index
    %47 = vector.load %arg3[%c0_28, %c0_29] : memref<8x32xf32, #tpu.memory_space<vmem>>, vector<8x32xf32>
    %48 = vector.extract_strided_slice %37 {offsets = [0, 2], sizes = [8, 1], strides = [1, 1]} : vector<8x128xf32> to vector<8x1xf32>
    %49 = vector.broadcast %48 : vector<8x1xf32> to vector<8x32xf32>
    %50 = arith.mulf %47, %49 : vector<8x32xf32>
    %51 = arith.addf %46, %50 : vector<8x32xf32>
    %c0_30 = arith.constant 0 : index
    %c0_31 = arith.constant 0 : index
    %52 = vector.load %arg8[%c0_30, %c0_31] : memref<8x32xf32, #tpu.memory_space<vmem>>, vector<8x32xf32>
    tpu.vector_store %arg8[%c0_30, %c0_31], %51 {strides = array<i32>} : memref<8x32xf32, #tpu.memory_space<vmem>>, vector<8x32xf32>,
    return
  }
  func.func @transform_0(%arg0: i32) -> (i32, i32) {
    %c0_i32 = arith.constant 0 : i32
    %c0_i32_0 = arith.constant 0 : i32
    return %arg0, %c0_i32 : i32, i32
  }
  func.func @transform_1(%arg0: i32) -> (i32, i32) {
    %c0_i32 = arith.constant 0 : i32
    %c0_i32_0 = arith.constant 0 : i32
    return %arg0, %c0_i32 : i32, i32
  }
  func.func @transform_2(%arg0: i32) -> (i32, i32) {
    %c0_i32 = arith.constant 0 : i32
    %c0_i32_0 = arith.constant 0 : i32
    return %arg0, %c0_i32 : i32, i32
  }
  func.func @transform_3(%arg0: i32) -> (i32, i32, i32) {
    %c0_i32 = arith.constant 0 : i32
    %c0_i32_0 = arith.constant 0 : i32
    %c0_i32_1 = arith.constant 0 : i32
    %c0_i32_2 = arith.constant 0 : i32
    return %c0_i32, %c0_i32_0, %c0_i32_1 : i32, i32, i32
  }
  func.func @transform_4(%arg0: i32) -> (i32, i32) {
    %c0_i32 = arith.constant 0 : i32
    %c0_i32_0 = arith.constant 0 : i32
    %c0_i32_1 = arith.constant 0 : i32
    return %c0_i32, %c0_i32_0 : i32, i32
  }
  func.func @transform_5(%arg0: i32) -> (i32, i32) {
    %c0_i32 = arith.constant 0 : i32
    %c0_i32_0 = arith.constant 0 : i32
    %c0_i32_1 = arith.constant 0 : i32
    return %c0_i32, %c0_i32_0 : i32, i32
  }
  func.func @transform_6(%arg0: i32) -> (i32, i32) {
    %c0_i32 = arith.constant 0 : i32
    %c0_i32_0 = arith.constant 0 : i32
    %c0_i32_1 = arith.constant 0 : i32
    return %c0_i32, %c0_i32_0 : i32, i32
  }
  func.func @transform_7(%arg0: i32) -> (i32, i32) {
    %c0_i32 = arith.constant 0 : i32
    %c0_i32_0 = arith.constant 0 : i32
    return %arg0, %c0_i32 : i32, i32
  }
}

</mosaic_0001>

<bundles_post_ra>
// kernel: tpu_custom_call.1
= control target key start
LH: loop header
LB: loop body
LE: loop exit
PB: predicated region body
PF: predicated region fallthrough
CT: control target
= control target key end

     0   :  { %12 = vsyncpa [#allocation3], 0  ;;  %s743_s0 = inlined_call_operand.hbm [shape: f32[8,32], index: 0, kind: input, shape index: {}]   ;;  %s744_s1 = inlined_call_operand.hbm [shape: f32[8,32], index: 1, kind: input, shape index: {}]   ;;  %s745_s2 = inlined_call_operand.hbm [shape: f32[8,32], index: 2, kind: input, shape index: {}]   ;;  %s746_s3 = inlined_call_operand.hbm [shape: bf16[3,32,32], index: 3, kind: input, shape index: {}]   ;;  %s747_s4 = inlined_call_operand.vmem [shape: f32[1,32], index: 4, kind: input, shape index: {}]   ;;  %s748_s5 = inlined_call_operand.vmem [shape: bf16[32,128], index: 5, kind: input, shape index: {}]   ;;  %s749_s6 = inlined_call_operand.vmem [shape: f32[1,128], index: 6, kind: input, shape index: {}]   ;;  %s750_s7 = inlined_call_operand.hbm [shape: f32[8,32], index: 7, kind: output, shape index: {}]  }
   0x1   :  { %13 = vsyncpa [#allocation6], 0 }
   0x2   :  { %14 = vsyncpa [#allocation9], 0 }
   0x3   :  { %15 = vsyncpa [#allocation4], 0  ;;  %s588_s24 = smov [#allocation5]   ;;  %s589_s26 = smov [#allocation2]  }
   0x4   :  { %s32_s25 = sshll.u32 %s588_s24, 4  ;;  %s22_s27 = sshll.u32 %s589_s26, 4  ;;  %s33_s25 = int_to_ptr.vmem [resolvable:$true] %s32_s25  ;;  %s23_s27 = int_to_ptr.vmem [resolvable:$true] %s22_s27 }
   0x5   :  { %s470_s30 = scalar_lea.hbm %s744_s1, 128 }
   0x6   :  { %p471_p0 = scmp.ne.s32.totalorder %s744_s1, %s470_s30  ;;  %p474_p1 = scmp.lt.u32.totalorder %s470_s30, %s744_s1 }
   0x8   :  { %p476_p2 = pnand %p474_p1, %p471_p0 }
   0xa   :  { %479 = shalt.err (!%p476_p2)
}
   0xb   :  { %s480_s12 = scalar_lea.vmem %s33_s25, 128  ;;  %p485_p4 = scmp.lt.s32.totalorder %s33_s25, %s33_s25 }
   0xc   :  { %p481_p3 = scmp.ne.s32.totalorder %s33_s25, %s480_s12  ;;  %p486_p5 = scmp.lt.s32.totalorder %s480_s12, %s480_s12 }
   0xe   :  { %p487_p6 = por %p486_p5, %p485_p4 }
  0x10   :  { %p488_p7 = pnand %p487_p6, %p481_p3 }
  0x12   :  { %491 = shalt.err (!%p488_p7)
}
  0x13   :  { %35 = dma.hbm_to_vmem [thread:$0]  %s744_s1, 128, %s33_s25, [#allocation6]  }
  0x14   :  { %s492_s17 = scalar_lea.hbm %s743_s0, 128 }
  0x15   :  { %p493_p8 = scmp.ne.s32.totalorder %s743_s0, %s492_s17  ;;  %p496_p9 = scmp.lt.u32.totalorder %s492_s17, %s743_s0 }
  0x17   :  { %p498_p10 = pnand %p496_p9, %p493_p8 }
  0x19   :  { %501 = shalt.err (!%p498_p10)
}
  0x1a   :  { %s502_s22 = scalar_lea.vmem %s23_s27, 128  ;;  %p507_p12 = scmp.lt.s32.totalorder %s23_s27, %s23_s27 }
  0x1b   :  { %p503_p11 = scmp.ne.s32.totalorder %s23_s27, %s502_s22  ;;  %p508_p13 = scmp.lt.s32.totalorder %s502_s22, %s502_s22 }
  0x1d   :  { %p509_p0 = por %p508_p13, %p507_p12 }
  0x1f   :  { %p510_p1 = pnand %p509_p0, %p503_p11 }
  0x21   :  { %513 = shalt.err (!%p510_p1)
}
  0x22   :  { %25 = dma.hbm_to_vmem [thread:$0]  %s743_s0, 128, %s23_s27, [#allocation3]  }
  0x23   :  { %s590_s24 = smov [#allocation7]   ;;  %s591_s26 = smov [#allocation8]  }
  0x24   :  { %s42_s25 = sshll.u32 %s590_s24, 4  ;;  %s51_s28 = sshll.u32 %s591_s26, 4  ;;  %s43_s25 = int_to_ptr.vmem [resolvable:$true] %s42_s25  ;;  %s664_s28 = int_to_ptr.vmem [resolvable:$true] %s51_s28 }
  0x25   :  { %s514_s8 = scalar_lea.hbm %s745_s2, 128 }
  0x26   :  { %p515_p2 = scmp.ne.s32.totalorder %s745_s2, %s514_s8  ;;  %p518_p3 = scmp.lt.u32.totalorder %s514_s8, %s745_s2 }
  0x28   :  { %p520_p4 = pnand %p518_p3, %p515_p2 }
  0x2a   :  { %523 = shalt.err (!%p520_p4)
}
  0x2b   :  { %s524_s0 = scalar_lea.vmem %s43_s25, 128  ;;  %p529_p6 = scmp.lt.s32.totalorder %s43_s25, %s43_s25 }
  0x2c   :  { %p525_p5 = scmp.ne.s32.totalorder %s43_s25, %s524_s0  ;;  %p530_p7 = scmp.lt.s32.totalorder %s524_s0, %s524_s0 }
  0x2e   :  { %p531_p8 = por %p530_p7, %p529_p6 }
  0x30   :  { %p532_p9 = pnand %p531_p8, %p525_p5 }
  0x32   :  { %535 = shalt.err (!%p532_p9)
}
  0x33   :  { %45 = dma.hbm_to_vmem [thread:$0]  %s745_s2, 128, %s43_s25, [#allocation6]  }
  0x34   :  { %s536_s16 = scalar_lea.hbm %s746_s3, 768 }
  0x35   :  { %p537_p10 = scmp.ne.s32.totalorder %s746_s3, %s536_s16  ;;  %p540_p11 = scmp.lt.u32.totalorder %s536_s16, %s746_s3 }
  0x37   :  { %p542_p12 = pnand %p540_p11, %p537_p10 }
  0x39   :  { %545 = shalt.err (!%p542_p12)
}
  0x3a   :  { %s546_s21 = scalar_lea.vmem %s664_s28, 768  ;;  %p551_p0 = scmp.lt.s32.totalorder %s664_s28, %s664_s28 }
  0x3b   :  { %p547_p13 = scmp.ne.s32.totalorder %s664_s28, %s546_s21  ;;  %p552_p1 = scmp.lt.s32.totalorder %s546_s21, %s546_s21 }
  0x3d   :  { %p553_p2 = por %p552_p1, %p551_p0 }
  0x3f   :  { %p554_p3 = pnand %p553_p2, %p547_p13 }
  0x41   :  { %557 = shalt.err (!%p554_p3)
}
  0x42   :  { %s592_s2 = smov 64   ;;  %s593_s22 = smov 4  }
  0x43   :  { %57 = dma.hbm_to_vmem [thread:$0]  %s746_s3, 768, %s664_s28, [#allocation9], %s592_s2, %s592_s2, %s593_s22  }
  0x44   :  { %580 = dma.done.wait [#allocation3], 128  }
  0x45   :  { %581 = vsyncadd [#allocation3], 4294967168 }
  0x46   :  { %582 = dma.done.wait [#allocation6], 256  }
  0x47   :  { %583 = vsyncadd [#allocation6], 4294967040 }
  0x48   :  { %584 = dma.done.wait [#allocation9], 768  }
  0x49   :  { %585 = vsyncadd [#allocation9], 4294966528  ;;  %v594_v0 = vmov 0.0   ;;  %vm595_vm0 = vmmov 0   ;;  %v458_v1 = vld [vmem:[#allocation8 + $0x10] sm:$0xff]   ;;  %v459_v2 = vld [vmem:[#allocation8] sm:$0xff]  }
  0x4a   :  { %411 = vmatprep.subr.bf16.mxu0 %v594_v0  ;;  %419 = vmatprep.subr.bf16.mxu1 %v594_v0  ;;  %v460_v3 = vld [vmem:[#allocation8 + $0x18] sm:$0xff]   ;;  %v461_v4 = vld [vmem:[#allocation8 + $0x8] sm:$0xff]   ;;  %v697_v5 = vld [vmem:[#allocation5] sm:$0xff]  ;;  %vm102_vm1 = vcmask 261120   ;;  %v596_v43 = vmov 2   ;;  %v597_v44 = vmov 0  }
  0x4b   :  { %415 = vmatprep.mubr.msk.bf16.mxu0 %vm595_vm0, %v594_v0  ;;  %423 = vmatprep.mubr.msk.bf16.mxu1 %vm595_vm0, %v594_v0  ;;  %v699_v6 = vld [vmem:[#allocation2] sm:$0xff]  ;;  %v84_v7 = vpack.c.bf16 %v697_v5, %v697_v5  ;;  %v462_v9 = vld [vmem:[#allocation8 + $0x20] sm:$0xff]   ;;  %v707_v11 = vld [vmem:[#allocation7] sm:$0xff]  ;;  %v598_v48 = vmov 1  }
  0x4c   :  { %412 = vmatpush3.bf16.msra.mxu0 %v458_v1  ;;  %420 = vmatpush3.bf16.msra.mxu1 %v459_v2  ;;  %v78_v8 = vpack.c.bf16 %v699_v6, %v699_v6  ;;  %v463_v10 = vld [vmem:[#allocation8 + $0x28] sm:$0xff]   ;;  %v202_v12 = vpack.c.bf16 %v707_v11, %v707_v11  ;;  %v464_v13 = vld [vmem:[%s748_s5] sm:$0xff]   ;;  %v465_v14 = vld [vmem:[%s748_s5 + $0x8] sm:$0xff]  }
  0x4d   :  { %413 = vmatprep.subr.bf16.mxu0 %v594_v0  ;;  %421 = vmatprep.subr.bf16.mxu1 %v594_v0  ;;  %v394_v25 = vld [vmem:[%s747_s4] ss:$0 sm:$0xff]  ;;  %s599_s4 = smov [#allocation10]  }
  0x4e   :  { %v395_v33 = vld [vmem:[%s749_s6] ss:$0 sm:$0xff]  ;;  %457 = vset.pattern.permute.xlu0 %v596_v43  ;;  %455 = vset.pattern.permute.xlu1 %v597_v44  ;;  %s374_s6 = sshll.u32 %s599_s4, 4  ;;  %s375_s6 = int_to_ptr.vmem [resolvable:$true] %s374_s6 }
  0x4f   :  { %s558_s8 = scalar_lea.vmem %s375_s6, 128  ;;  %p563_p5 = scmp.lt.s32.totalorder %s375_s6, %s375_s6 }
  0x50   :  { %414 = vmatpush3.bf16.msra.mxu0 %v460_v3  ;;  %422 = vmatpush3.bf16.msra.mxu1 %v461_v4  ;;  %p559_p4 = scmp.ne.s32.totalorder %s375_s6, %s558_s8  ;;  %p564_p6 = scmp.lt.s32.totalorder %s558_s8, %s558_s8 }
  0x51   :  { %427 = vmatprep.subr.bf16.mxu0 %v594_v0  ;;  %435 = vmatprep.subr.bf16.mxu1 %v594_v0 }
  0x52   :  { %p565_p7 = por %p564_p6, %p563_p5 }
  0x53   :  { %416 = vmatmul.mubr.msk.bf16.vlgmr.msra.gmra.mrb[0].mxu0 %vm102_vm1, %v84_v7  ;;  %424 = vmatmul.mubr.msk.bf16.vlgmr.msra.gmra.mrb[0].mxu1 %vm102_vm1, %v78_v8 }
  0x54   :  { %428 = vmatpush3.bf16.msra.mxu0 %v462_v9  ;;  %431 = vmatprep.mubr.msk.bf16.mxu0 %vm595_vm0, %v594_v0  ;;  %p566_p8 = pnand %p565_p7, %p559_p4 }
  0x55   :  { %429 = vmatprep.subr.bf16.mxu0 %v594_v0  ;;  %439 = vmatprep.mubr.msk.bf16.mxu1 %vm595_vm0, %v594_v0 }
  0x56   :  { %436 = vmatpush3.bf16.msra.mxu1 %v464_v13 }
  0x57   :  { %437 = vmatprep.subr.bf16.mxu1 %v594_v0 }
  0x58   :  { %430 = vmatpush3.bf16.msra.mxu0 %v463_v10 }
  0x5a   :  { %438 = vmatpush3.bf16.msra.mxu1 %v465_v14 }
  0x5b   :  { %432 = vmatmul.mubr.msk.bf16.vlgmr.msra.gmra.mrb[4].mxu0 %vm102_vm1, %v202_v12 }
 0x126   :  { %v140_v15 = vpop.f32.mrb[0].mxu0  ;;  %v195_v17 = vpop.f32.mrb[0].mxu1 }
 0x127   :  { %v417_v16 = vpop.f32.mrb[1].mxu0  ;;  %v196_v18 = vadd.f32 %v195_v17, %v140_v15  ;;  %v425_v20 = vpop.f32.mrb[1].mxu1 }
 0x128   :  { %v143_v19 = vpop.f32.mrb[2].mxu0  ;;  %v198_v22 = vpop.f32.mrb[2].mxu1 }
 0x129   :  { %v418_v21 = vpop.f32.mrb[3].mxu0  ;;  %v426_v23 = vpop.f32.mrb[3].mxu1 }
 0x12e   :  { %v257_v24 = vpop.f32.mrb[4].mxu0 }
 0x12f   :  { %v263_v26 = vadd.f32 %v257_v24, %v196_v18  ;;  %v433_v27 = vpop.f32.mrb[5].mxu0 }
 0x130   :  { %v260_v28 = vpop.f32.mrb[6].mxu0 }
 0x131   :  { %v271_v29 = vadd.f32 %v394_v25, %v263_v26  ;;  %v434_v30 = vpop.f32.mrb[7].mxu0 }
 0x133   :  { %v272_v31 = vmax.f32 %v271_v29, 0.0 }
 0x135   :  { %v273_v32 = vpack.c.bf16 %v272_v31, %v272_v31 }
 0x137   :  { %440 = vmatmul.mubr.msk.bf16.vlgmr.msra.gmra.mrb[4].mxu1 %vm102_vm1, %v273_v32 }
 0x20a   :  { %v334_v34 = vpop.f32.mrb[4].mxu1 }
 0x20b   :  { %v335_v35 = vadd.f32 %v395_v33, %v334_v34  ;;  %v441_v36 = vpop.f32.mrb[5].mxu1 }
 0x20c   :  { %v337_v37 = vpop.f32.mrb[6].mxu1 }
 0x20d   :  { %340 = vmax.xlane.f32.xlu0 %v335_v35  ;;  %v442_v38 = vpop.f32.mrb[7].mxu1 }
 0x29a   :  { %v341_v39 = vpop.xlane.xlu0 %340 }
 0x29b   :  { %v342_v40 = vsub.f32 %v335_v35, %v341_v39 }
 0x29d   :  { %v343_v41 = vmul.f32 1.442695, %v342_v40 }
 0x29f   :  { %466 = vpow2.f32 %v343_v41 }
 0x2a9   :  { %v467_v42 = vpop.eup %466 }
 0x2aa   :  { %345 = vadd.xlane.f32.xlu0 %v467_v42 }
 0x337   :  { %v346_v45 = vpop.xlane.xlu0 %345 }
 0x338   :  { %468 = vrcp.f32 %v346_v45 }
 0x342   :  { %v469_v46 = vpop.eup %468 }
 0x343   :  { %v348_v47 = vmul.f32 %v469_v46, %v467_v42 }
 0x345   :  { %362 = vperm.xlu0 %457, %v348_v47   ;;  %351 = vperm.xlu1 %455, %v348_v47  }
 0x349   :  { %456 = vset.pattern.permute.xlu1 %v598_v48 }
 0x34a   :  { %356 = vperm.xlu1 %456, %v348_v47  }
 0x3c4   :  { %v352_v49 = vpop.permute.xlu1 %351  ;;  %v363_v50 = vpop.permute.xlu0 %362 }
 0x3c5   :  { %v354_v52 = vmul.f32 %v352_v49, %v699_v6  ;;  %v365_v54 = vmul.f32 %v363_v50, %v707_v11 }
 0x3c9   :  { %v357_v51 = vpop.permute.xlu1 %356 }
 0x3ca   :  { %v359_v53 = vmul.f32 %v357_v51, %v697_v5 }
 0x3cc   :  { %v360_v55 = vadd.f32 %v359_v53, %v354_v52 }
 0x3ce   :  { %v366_v56 = vadd.f32 %v365_v54, %v360_v55 }
 0x3d0   :  { %367 = vst.msk [vmem:[#allocation10] sm:$0xff] %vm102_vm1, %v366_v56 }
 0x3d1   :  { %569 = shalt.err (!%p566_p8)
}
 0x3d2   :  { %s570_s11 = scalar_lea.hbm %s750_s7, 128 }
 0x3d3   :  { %p571_p9 = scmp.ne.s32.totalorder %s750_s7, %s570_s11  ;;  %p574_p10 = scmp.lt.u32.totalorder %s570_s11, %s750_s7 }
 0x3d5   :  { %p576_p11 = pnand %p574_p10, %p571_p9 }
 0x3d7   :  { %579 = shalt.err (!%p576_p11)
}
 0x3d8   :  { %377 = dma.vmem_to_hbm [thread:$0]  %s375_s6, 128, %s750_s7, [#allocation4]  }
 0x3d9   :  { %586 = dma.done.wait [#allocation4], 128  }
 0x3da   :  { %587 = vsyncadd [#allocation4], 4294967168 }
 0x3db   :  { %381 = vsyncpa [#allocation3], 1 }
 0x3dc   :  { %382 = vsyncpa [#allocation6], 1 }
 0x3dd   :  { %383 = vsyncpa [#allocation9], 1 }
 0x3de   :  { %384 = vsyncpa [#allocation4], 1 }

// kernel: tpu_custom_call.1
= control target key start
LH: loop header
LB: loop body
LE: loop exit
PB: predicated region body
PF: predicated region fallthrough
CT: control target
= control target key end

     0   :  { %12 = vsyncpa [#allocation3], 0  ;;  %s743_s0 = inlined_call_operand.hbm [shape: f32[8,32], index: 0, kind: input, shape index: {}]   ;;  %s744_s1 = inlined_call_operand.hbm [shape: f32[8,32], index: 1, kind: input, shape index: {}]   ;;  %s745_s2 = inlined_call_operand.hbm [shape: f32[8,32], index: 2, kind: input, shape index: {}]   ;;  %s746_s3 = inlined_call_operand.hbm [shape: bf16[3,32,32], index: 3, kind: input, shape index: {}]   ;;  %s747_s4 = inlined_call_operand.vmem [shape: f32[1,32], index: 4, kind: input, shape index: {}]   ;;  %s748_s5 = inlined_call_operand.vmem [shape: bf16[32,128], index: 5, kind: input, shape index: {}]   ;;  %s749_s6 = inlined_call_operand.vmem [shape: f32[1,128], index: 6, kind: input, shape index: {}]   ;;  %s750_s7 = inlined_call_operand.hbm [shape: f32[8,32], index: 7, kind: output, shape index: {}]  }
   0x1   :  { %13 = vsyncpa [#allocation6], 0 }
   0x2   :  { %14 = vsyncpa [#allocation9], 0 }
   0x3   :  { %15 = vsyncpa [#allocation4], 0  ;;  %s588_s24 = smov [#allocation5]   ;;  %s589_s26 = smov [#allocation2]  }
   0x4   :  { %s32_s25 = sshll.u32 %s588_s24, 4  ;;  %s22_s27 = sshll.u32 %s589_s26, 4  ;;  %s33_s25 = int_to_ptr.vmem [resolvable:$true] %s32_s25  ;;  %s23_s27 = int_to_ptr.vmem [resolvable:$true] %s22_s27 }
   0x5   :  { %s470_s30 = scalar_lea.hbm %s744_s1, 128 }
   0x6   :  { %p471_p0 = scmp.ne.s32.totalorder %s744_s1, %s470_s30  ;;  %p474_p1 = scmp.lt.u32.totalorder %s470_s30, %s744_s1 }
   0x8   :  { %p476_p2 = pnand %p474_p1, %p471_p0 }
   0xa   :  { %479 = shalt.err (!%p476_p2)
}
   0xb   :  { %s480_s12 = scalar_lea.vmem %s33_s25, 128  ;;  %p485_p4 = scmp.lt.s32.totalorder %s33_s25, %s33_s25 }
   0xc   :  { %p481_p3 = scmp.ne.s32.totalorder %s33_s25, %s480_s12  ;;  %p486_p5 = scmp.lt.s32.totalorder %s480_s12, %s480_s12 }
   0xe   :  { %p487_p6 = por %p486_p5, %p485_p4 }
  0x10   :  { %p488_p7 = pnand %p487_p6, %p481_p3 }
  0x12   :  { %491 = shalt.err (!%p488_p7)
}
  0x13   :  { %35 = dma.hbm_to_vmem [thread:$0]  %s744_s1, 128, %s33_s25, [#allocation6]  }
  0x14   :  { %s492_s17 = scalar_lea.hbm %s743_s0, 128 }
  0x15   :  { %p493_p8 = scmp.ne.s32.totalorder %s743_s0, %s492_s17  ;;  %p496_p9 = scmp.lt.u32.totalorder %s492_s17, %s743_s0 }
  0x17   :  { %p498_p10 = pnand %p496_p9, %p493_p8 }
  0x19   :  { %501 = shalt.err (!%p498_p10)
}
  0x1a   :  { %s502_s22 = scalar_lea.vmem %s23_s27, 128  ;;  %p507_p12 = scmp.lt.s32.totalorder %s23_s27, %s23_s27 }
  0x1b   :  { %p503_p11 = scmp.ne.s32.totalorder %s23_s27, %s502_s22  ;;  %p508_p13 = scmp.lt.s32.totalorder %s502_s22, %s502_s22 }
  0x1d   :  { %p509_p0 = por %p508_p13, %p507_p12 }
  0x1f   :  { %p510_p1 = pnand %p509_p0, %p503_p11 }
  0x21   :  { %513 = shalt.err (!%p510_p1)
}
  0x22   :  { %25 = dma.hbm_to_vmem [thread:$0]  %s743_s0, 128, %s23_s27, [#allocation3]  }
  0x23   :  { %s590_s24 = smov [#allocation7]   ;;  %s591_s26 = smov [#allocation8]  }
  0x24   :  { %s42_s25 = sshll.u32 %s590_s24, 4  ;;  %s51_s28 = sshll.u32 %s591_s26, 4  ;;  %s43_s25 = int_to_ptr.vmem [resolvable:$true] %s42_s25  ;;  %s664_s28 = int_to_ptr.vmem [resolvable:$true] %s51_s28 }
  0x25   :  { %s514_s8 = scalar_lea.hbm %s745_s2, 128 }
  0x26   :  { %p515_p2 = scmp.ne.s32.totalorder %s745_s2, %s514_s8  ;;  %p518_p3 = scmp.lt.u32.totalorder %s514_s8, %s745_s2 }
  0x28   :  { %p520_p4 = pnand %p518_p3, %p515_p2 }
  0x2a   :  { %523 = shalt.err (!%p520_p4)
}
  0x2b   :  { %s524_s0 = scalar_lea.vmem %s43_s25, 128  ;;  %p529_p6 = scmp.lt.s32.totalorder %s43_s25, %s43_s25 }
  0x2c   :  { %p525_p5 = scmp.ne.s32.totalorder %s43_s25, %s524_s0  ;;  %p530_p7 = scmp.lt.s32.totalorder %s524_s0, %s524_s0 }
  0x2e   :  { %p531_p8 = por %p530_p7, %p529_p6 }
  0x30   :  { %p532_p9 = pnand %p531_p8, %p525_p5 }
  0x32   :  { %535 = shalt.err (!%p532_p9)
}
  0x33   :  { %45 = dma.hbm_to_vmem [thread:$0]  %s745_s2, 128, %s43_s25, [#allocation6]  }
  0x34   :  { %s536_s16 = scalar_lea.hbm %s746_s3, 768 }
  0x35   :  { %p537_p10 = scmp.ne.s32.totalorder %s746_s3, %s536_s16  ;;  %p540_p11 = scmp.lt.u32.totalorder %s536_s16, %s746_s3 }
  0x37   :  { %p542_p12 = pnand %p540_p11, %p537_p10 }
  0x39   :  { %545 = shalt.err (!%p542_p12)
}
  0x3a   :  { %s546_s21 = scalar_lea.vmem %s664_s28, 768  ;;  %p551_p0 = scmp.lt.s32.totalorder %s664_s28, %s664_s28 }
  0x3b   :  { %p547_p13 = scmp.ne.s32.totalorder %s664_s28, %s546_s21  ;;  %p552_p1 = scmp.lt.s32.totalorder %s546_s21, %s546_s21 }
  0x3d   :  { %p553_p2 = por %p552_p1, %p551_p0 }
  0x3f   :  { %p554_p3 = pnand %p553_p2, %p547_p13 }
  0x41   :  { %557 = shalt.err (!%p554_p3)
}
  0x42   :  { %s592_s2 = smov 64   ;;  %s593_s22 = smov 4  }
  0x43   :  { %57 = dma.hbm_to_vmem [thread:$0]  %s746_s3, 768, %s664_s28, [#allocation9], %s592_s2, %s592_s2, %s593_s22  }
  0x44   :  { %580 = dma.done.wait [#allocation3], 128  }
  0x45   :  { %581 = vsyncadd [#allocation3], 4294967168 }
  0x46   :  { %582 = dma.done.wait [#allocation6], 256  }
  0x47   :  { %583 = vsyncadd [#allocation6], 4294967040 }
  0x48   :  { %584 = dma.done.wait [#allocation9], 768  }
  0x49   :  { %585 = vsyncadd [#allocation9], 4294966528  ;;  %v594_v0 = vmov 0.0   ;;  %vm595_vm0 = vmmov 0   ;;  %v458_v1 = vld [vmem:[#allocation8 + $0x10] sm:$0xff]   ;;  %v459_v2 = vld [vmem:[#allocation8] sm:$0xff]  }
  0x4a   :  { %411 = vmatprep.subr.bf16.mxu0 %v594_v0  ;;  %419 = vmatprep.subr.bf16.mxu1 %v594_v0  ;;  %v460_v3 = vld [vmem:[#allocation8 + $0x18] sm:$0xff]   ;;  %v461_v4 = vld [vmem:[#allocation8 + $0x8] sm:$0xff]   ;;  %v697_v5 = vld [vmem:[#allocation5] sm:$0xff]  ;;  %vm102_vm1 = vcmask 261120   ;;  %v596_v43 = vmov 2   ;;  %v597_v44 = vmov 0  }
  0x4b   :  { %415 = vmatprep.mubr.msk.bf16.mxu0 %vm595_vm0, %v594_v0  ;;  %423 = vmatprep.mubr.msk.bf16.mxu1 %vm595_vm0, %v594_v0  ;;  %v699_v6 = vld [vmem:[#allocation2] sm:$0xff]  ;;  %v84_v7 = vpack.c.bf16 %v697_v5, %v697_v5  ;;  %v462_v9 = vld [vmem:[#allocation8 + $0x20] sm:$0xff]   ;;  %v707_v11 = vld [vmem:[#allocation7] sm:$0xff]  ;;  %v598_v48 = vmov 1  }
  0x4c   :  { %412 = vmatpush3.bf16.msra.mxu0 %v458_v1  ;;  %420 = vmatpush3.bf16.msra.mxu1 %v459_v2  ;;  %v78_v8 = vpack.c.bf16 %v699_v6, %v699_v6  ;;  %v463_v10 = vld [vmem:[#allocation8 + $0x28] sm:$0xff]   ;;  %v202_v12 = vpack.c.bf16 %v707_v11, %v707_v11  ;;  %v464_v13 = vld [vmem:[%s748_s5] sm:$0xff]   ;;  %v465_v14 = vld [vmem:[%s748_s5 + $0x8] sm:$0xff]  }
  0x4d   :  { %413 = vmatprep.subr.bf16.mxu0 %v594_v0  ;;  %421 = vmatprep.subr.bf16.mxu1 %v594_v0  ;;  %v394_v25 = vld [vmem:[%s747_s4] ss:$0 sm:$0xff]  ;;  %s599_s4 = smov [#allocation10]  }
  0x4e   :  { %v395_v33 = vld [vmem:[%s749_s6] ss:$0 sm:$0xff]  ;;  %457 = vset.pattern.permute.xlu0 %v596_v43  ;;  %455 = vset.pattern.permute.xlu1 %v597_v44  ;;  %s374_s6 = sshll.u32 %s599_s4, 4  ;;  %s375_s6 = int_to_ptr.vmem [resolvable:$true] %s374_s6 }
  0x4f   :  { %s558_s8 = scalar_lea.vmem %s375_s6, 128  ;;  %p563_p5 = scmp.lt.s32.totalorder %s375_s6, %s375_s6 }
  0x50   :  { %414 = vmatpush3.bf16.msra.mxu0 %v460_v3  ;;  %422 = vmatpush3.bf16.msra.mxu1 %v461_v4  ;;  %p559_p4 = scmp.ne.s32.totalorder %s375_s6, %s558_s8  ;;  %p564_p6 = scmp.lt.s32.totalorder %s558_s8, %s558_s8 }
  0x51   :  { %427 = vmatprep.subr.bf16.mxu0 %v594_v0  ;;  %435 = vmatprep.subr.bf16.mxu1 %v594_v0 }
  0x52   :  { %p565_p7 = por %p564_p6, %p563_p5 }
  0x53   :  { %416 = vmatmul.mubr.msk.bf16.vlgmr.msra.gmra.mrb[0].mxu0 %vm102_vm1, %v84_v7  ;;  %424 = vmatmul.mubr.msk.bf16.vlgmr.msra.gmra.mrb[0].mxu1 %vm102_vm1, %v78_v8 }
  0x54   :  { %428 = vmatpush3.bf16.msra.mxu0 %v462_v9  ;;  %431 = vmatprep.mubr.msk.bf16.mxu0 %vm595_vm0, %v594_v0  ;;  %p566_p8 = pnand %p565_p7, %p559_p4 }
  0x55   :  { %429 = vmatprep.subr.bf16.mxu0 %v594_v0  ;;  %439 = vmatprep.mubr.msk.bf16.mxu1 %vm595_vm0, %v594_v0 }
  0x56   :  { %436 = vmatpush3.bf16.msra.mxu1 %v464_v13 }
  0x57   :  { %437 = vmatprep.subr.bf16.mxu1 %v594_v0 }
  0x58   :  { %430 = vmatpush3.bf16.msra.mxu0 %v463_v10 }
  0x5a   :  { %438 = vmatpush3.bf16.msra.mxu1 %v465_v14 }
  0x5b   :  { %432 = vmatmul.mubr.msk.bf16.vlgmr.msra.gmra.mrb[4].mxu0 %vm102_vm1, %v202_v12 }
 0x126   :  { %v140_v15 = vpop.f32.mrb[0].mxu0  ;;  %v195_v17 = vpop.f32.mrb[0].mxu1 }
 0x127   :  { %v417_v16 = vpop.f32.mrb[1].mxu0  ;;  %v196_v18 = vadd.f32 %v195_v17, %v140_v15  ;;  %v425_v20 = vpop.f32.mrb[1].mxu1 }
 0x128   :  { %v143_v19 = vpop.f32.mrb[2].mxu0  ;;  %v198_v22 = vpop.f32.mrb[2].mxu1 }
 0x129   :  { %v418_v21 = vpop.f32.mrb[3].mxu0  ;;  %v426_v23 = vpop.f32.mrb[3].mxu1 }
 0x12e   :  { %v257_v24 = vpop.f32.mrb[4].mxu0 }
 0x12f   :  { %v263_v26 = vadd.f32 %v257_v24, %v196_v18  ;;  %v433_v27 = vpop.f32.mrb[5].mxu0 }
 0x130   :  { %v260_v28 = vpop.f32.mrb[6].mxu0 }
 0x131   :  { %v271_v29 = vadd.f32 %v394_v25, %v263_v26  ;;  %v434_v30 = vpop.f32.mrb[7].mxu0 }
 0x133   :  { %v272_v31 = vmax.f32 %v271_v29, 0.0 }
 0x135   :  { %v273_v32 = vpack.c.bf16 %v272_v31, %v272_v31 }
 0x137   :  { %440 = vmatmul.mubr.msk.bf16.vlgmr.msra.gmra.mrb[4].mxu1 %vm102_vm1, %v273_v32 }
 0x20a   :  { %v334_v34 = vpop.f32.mrb[4].mxu1 }
 0x20b   :  { %v335_v35 = vadd.f32 %v395_v33, %v334_v34  ;;  %v441_v36 = vpop.f32.mrb[5].mxu1 }
 0x20c   :  { %v337_v37 = vpop.f32.mrb[6].mxu1 }
 0x20d   :  { %340 = vmax.xlane.f32.xlu0 %v335_v35  ;;  %v442_v38 = vpop.f32.mrb[7].mxu1 }
 0x29a   :  { %v341_v39 = vpop.xlane.xlu0 %340 }
 0x29b   :  { %v342_v40 = vsub.f32 %v335_v35, %v341_v39 }
 0x29d   :  { %v343_v41 = vmul.f32 1.442695, %v342_v40 }
 0x29f   :  { %466 = vpow2.f32 %v343_v41 }
 0x2a9   :  { %v467_v42 = vpop.eup %466 }
 0x2aa   :  { %345 = vadd.xlane.f32.xlu0 %v467_v42 }
 0x337   :  { %v346_v45 = vpop.xlane.xlu0 %345 }
 0x338   :  { %468 = vrcp.f32 %v346_v45 }
 0x342   :  { %v469_v46 = vpop.eup %468 }
 0x343   :  { %v348_v47 = vmul.f32 %v469_v46, %v467_v42 }
 0x345   :  { %362 = vperm.xlu0 %457, %v348_v47   ;;  %351 = vperm.xlu1 %455, %v348_v47  }
 0x349   :  { %456 = vset.pattern.permute.xlu1 %v598_v48 }
 0x34a   :  { %356 = vperm.xlu1 %456, %v348_v47  }
 0x3c4   :  { %v352_v49 = vpop.permute.xlu1 %351  ;;  %v363_v50 = vpop.permute.xlu0 %362 }
 0x3c5   :  { %v354_v52 = vmul.f32 %v352_v49, %v699_v6  ;;  %v365_v54 = vmul.f32 %v363_v50, %v707_v11 }
 0x3c9   :  { %v357_v51 = vpop.permute.xlu1 %356 }
 0x3ca   :  { %v359_v53 = vmul.f32 %v357_v51, %v697_v5 }
 0x3cc   :  { %v360_v55 = vadd.f32 %v359_v53, %v354_v52 }
 0x3ce   :  { %v366_v56 = vadd.f32 %v365_v54, %v360_v55 }
 0x3d0   :  { %367 = vst.msk [vmem:[#allocation10] sm:$0xff] %vm102_vm1, %v366_v56 }
 0x3d1   :  { %569 = shalt.err (!%p566_p8)
}
 0x3d2   :  { %s570_s11 = scalar_lea.hbm %s750_s7, 128 }
 0x3d3   :  { %p571_p9 = scmp.ne.s32.totalorder %s750_s7, %s570_s11  ;;  %p574_p10 = scmp.lt.u32.totalorder %s570_s11, %s750_s7 }
 0x3d5   :  { %p576_p11 = pnand %p574_p10, %p571_p9 }
 0x3d7   :  { %579 = shalt.err (!%p576_p11)
}
 0x3d8   :  { %377 = dma.vmem_to_hbm [thread:$0]  %s375_s6, 128, %s750_s7, [#allocation4]  }
 0x3d9   :  { %586 = dma.done.wait [#allocation4], 128  }
 0x3da   :  { %587 = vsyncadd [#allocation4], 4294967168 }
 0x3db   :  { %381 = vsyncpa [#allocation3], 1 }
 0x3dc   :  { %382 = vsyncpa [#allocation6], 1 }
 0x3dd   :  { %383 = vsyncpa [#allocation9], 1 }
 0x3de   :  { %384 = vsyncpa [#allocation4], 1 }

</bundles_post_ra>
